<compile_context>
chip_gen: v6e
topology: v6e:2x2x1
jax: 0.10.0
libtpu: 0.0.40
codegen_flags: <defaults>
</compile_context>

<pallas_src>
import math

import jax
import jax.numpy as jnp
from jax.experimental import pallas as pl
from jax.experimental.pallas import tpu as pltpu

LANE = 128


def _round_up(n, m):
    return ((n + m - 1) // m) * m


# ----------------------------------------------------------------------------
# Pallas kernel: fused MLP -> (Fourier Linear x IFT, pre-folded)
# ----------------------------------------------------------------------------
def _symviewpair_kernel(x_ref, w1_ref, b1_ref, w2_ref, b2_ref,
                        w_ift_ref, b_ift_ref, out_ref):
    # --- MLP block 1: Linear + nonlinearity (layer_factory) ---
    h1 = jnp.dot(x_ref[...], w1_ref[...], preferred_element_type=jnp.float32)
    h1 = jnp.maximum(h1 + b1_ref[...], 0.0)                      # f32 epilogue

    # --- MLP block 2: Linear + nonlinearity (layer_factory) ---
    h2 = jnp.dot(h1.astype(w2_ref.dtype), w2_ref[...],
                 preferred_element_type=jnp.float32)
    h2 = jnp.maximum(h2 + b2_ref[...], 0.0)

    # --- Final equivariant Linear -> Fourier coeffs -> inverse Fourier
    #     transform, folded into a single (lane-padded) matmul. ---
    logits = jnp.dot(h2.astype(w_ift_ref.dtype), w_ift_ref[...],
                     preferred_element_type=jnp.float32)          # (TB, Gp)

    # Store only the real G logit columns; padded lanes never leave VMEM.
    g = out_ref.shape[-1]
    out_ref[...] = logits[:, :g] + b_ift_ref[...]                 # (TB, G)


# ----------------------------------------------------------------------------
# One-time parameter preparation: fold, pad, cast (hoisted out of per-call path)
# ----------------------------------------------------------------------------
def prepare_params(params, *, compute_dtype=jnp.bfloat16):
    """Fold the final Linear with the IFT, zero-pad fibers to 128 lanes and
    cast the MXU inputs.  Run once; the result is reused by every forward."""
    w1, b1, w2, b2, w3, b3, ift = params
    F0, H1 = w1.shape
    H2 = w2.shape[1]
    G = ift.shape[1]

    H1p = _round_up(H1, LANE)
    H2p = _round_up(H2, LANE)
    Gp = _round_up(G, LANE)

    # Fold in f32 *before* any low-precision cast (exact: no nonlinearity
    # between the last Linear and the inverse Fourier transform).
    w_ift = (w3 @ ift).astype(jnp.float32)                 # (H2, G)
    b_ift = (b3 @ ift).astype(jnp.float32)                 # (1, G)  stays f32

    # Zero-pad fibers to full 128-lane vregs (exact: ReLU(0)=0 and padded
    # weight rows/columns are zero, so padded lanes never reach the output).
    w1p = jnp.zeros((F0, H1p), jnp.float32).at[:, :H1].set(w1)
    b1p = jnp.zeros((1, H1p), jnp.float32).at[:, :H1].set(b1)
    w2p = jnp.zeros((H1p, H2p), jnp.float32).at[:H1, :H2].set(w2)
    b2p = jnp.zeros((1, H2p), jnp.float32).at[:, :H2].set(b2)
    w_iftp = jnp.zeros((H2p, Gp), jnp.float32).at[:H2, :G].set(w_ift)

    # Low-precision MXU inputs; accumulation / bias / ReLU epilogue stay f32.
    w1p = w1p.astype(compute_dtype)
    w2p = w2p.astype(compute_dtype)
    w_iftp = w_iftp.astype(compute_dtype)

    return (w1p, b1p, w2p, b2p, w_iftp, b_ift)


# ----------------------------------------------------------------------------
# Per-call wrapper: pad x, tile the batch, pallas_call, slice.
# ----------------------------------------------------------------------------
def sym_view_pair_classifier(x, prepared_params, *, batch_tile=1024):
    """x: (B, F0) float32.  prepared_params: output of `prepare_params`.
    Returns logits (B, G) float32."""
    w1p, b1p, w2p, b2p, w_iftp, b_ift = prepared_params
    B, F0 = x.shape
    H1p = w1p.shape[1]
    H2p = w2p.shape[1]
    Gp = w_iftp.shape[1]
    G = b_ift.shape[1]
    compute_dtype = w1p.dtype

    # Batch tiling: sublane-aligned for the MXU-input dtype (16 for bf16).
    sub = 16 if jnp.dtype(compute_dtype).itemsize < 4 else 8
    Bmin = _round_up(B, sub)
    TB = _round_up(min(batch_tile, Bmin), sub)
    # v7x has 2 TensorCores: if the whole batch fits in one tile but can be
    # split into >=2 sublane-aligned tiles, halve the tile so both get work.
    if TB >= Bmin and Bmin >= 2 * sub:
        TB = _round_up(Bmin // 2, sub)
    Bp = _round_up(B, TB)
    n_tiles = Bp // TB

    x = x.astype(compute_dtype)
    xp = x if Bp == B else jnp.zeros((Bp, F0), compute_dtype).at[:B, :].set(x)

    def weight_spec(a):
        # Constant index_map -> block never changes -> weights stay resident.
        return pl.BlockSpec(a.shape, lambda i: (0,) * a.ndim)

    dbytes = jnp.dtype(compute_dtype).itemsize
    cost = pl.CostEstimate(
        flops=2 * Bp * (F0 * H1p + H1p * H2p + H2p * Gp),
        transcendentals=0,
        bytes_accessed=(Bp * F0 * dbytes + Bp * G * 4
                        + (F0 * H1p + H1p * H2p + H2p * Gp) * dbytes
                        + (H1p + H2p + G) * 4),
    )

    out = pl.pallas_call(
        _symviewpair_kernel,
        out_shape=jax.ShapeDtypeStruct((Bp, G), jnp.float32),
        grid=(n_tiles,),
        in_specs=[
            pl.BlockSpec((TB, F0), lambda i: (i, 0)),      # x: tiled over batch
            weight_spec(w1p), weight_spec(b1p),            # weights/biases stay
            weight_spec(w2p), weight_spec(b2p),            # resident in VMEM
            weight_spec(w_iftp), weight_spec(b_ift),
        ],
        # Only the real G logit columns are written to HBM (G equals the full
        # last dim of the output array, so this BlockSpec is legal).
        out_specs=pl.BlockSpec((TB, G), lambda i: (i, 0)),
        compiler_params=pltpu.CompilerParams(
            dimension_semantics=("parallel",),             # shard across TCs
            vmem_limit_bytes=32 << 20,
        ),
        cost_estimate=cost,
    )(xp, w1p, b1p, w2p, b2p, w_iftp, b_ift)

    return out if Bp == B else out[:B]


# ----------------------------------------------------------------------------
# Deterministic parameter construction (synthetic, matches __init__ shapes)
# ----------------------------------------------------------------------------
def make_params(key, fiber_sizes, logits_max_freq, n_grid):
    """fiber_sizes = [F0, H1, H2]   (the `layer_types` fiber sizes)
       fourier_type dim = 1 + 2*logits_max_freq  (channels=1, SO(2) irreps)."""
    f0, h1, h2 = fiber_sizes
    d_fourier = 1 + 2 * logits_max_freq

    k1, k2, k3, k4, k5 = jax.random.split(key, 5)
    w1 = jax.random.normal(k1, (f0, h1), jnp.float32) / math.sqrt(f0)
    b1 = jax.random.normal(k2, (1, h1), jnp.float32) * 0.01
    w2 = jax.random.normal(k3, (h1, h2), jnp.float32) / math.sqrt(h1)
    b2 = jax.random.normal(k4, (1, h2), jnp.float32) * 0.01
    w3 = jax.random.normal(k5, (h2, d_fourier), jnp.float32) / math.sqrt(h2)
    # escnn Linear bias acts only on the trivial irrep (coefficient 0):
    b3 = jnp.zeros((1, d_fourier), jnp.float32).at[0, 0].set(0.05)

    # Inverse Fourier transform matrix for SO(2), evaluated on a uniform grid
    # of `n_grid` rotations about z (subgroup_id = (False, -1)):
    #   f(theta_g) = c0 + sum_k sqrt(2) * (c_k^cos cos(k theta_g) + c_k^sin sin(k theta_g))
    thetas = 2.0 * math.pi * jnp.arange(n_grid, dtype=jnp.float32) / n_grid
    rows = [jnp.ones_like(thetas)]
    for k in range(1, logits_max_freq + 1):
        rows.append(math.sqrt(2.0) * jnp.cos(k * thetas))
        rows.append(math.sqrt(2.0) * jnp.sin(k * thetas))
    ift = jnp.stack(rows, axis=0).astype(jnp.float32)       # (d_fourier, G)

    return (w1, b1, w2, b2, w3, b3, ift)


# ----------------------------------------------------------------------------
def _reference(x, params):
    w1, b1, w2, b2, w3, b3, ift = params
    h1 = jnp.maximum(x @ w1 + b1, 0.0)
    h2 = jnp.maximum(h1 @ w2 + b2, 0.0)
    xf = h2 @ w3 + b3
    logits = xf @ ift                        # (B, G) == (B, 1, G).reshape(B, G)
    return logits


if __name__ == "__main__":
    key = jax.random.PRNGKey(0)
    kx, kp = jax.random.split(key)

    B = 8                        # minibatch
    fiber_sizes = [64, 48, 32]   # layer_types fiber sizes (input F = 64)
    logits_max_freq = 2          # -> fourier dim = 5
    n_grid = 8                   # |logits_grid|

    x = jax.random.normal(kx, (B, fiber_sizes[0]), jnp.float32)
    params = make_params(kp, fiber_sizes, logits_max_freq, n_grid)
    ref = _reference(x, params)

    fwd = jax.jit(sym_view_pair_classifier, static_argnames=("batch_tile",))

    # f32 MXU-input path: exact match against the reference.
    prep_f32 = prepare_params(params, compute_dtype=jnp.float32)
    out_f32 = jax.block_until_ready(fwd(x, prep_f32))
    assert out_f32.shape == (B, n_grid)
    assert jnp.allclose(out_f32, ref, atol=1e-4, rtol=1e-4)

    # bf16 MXU-input path (default; memory-bound kernel -> halves HBM fetch):
    prep_bf16 = prepare_params(params)       # compute_dtype=jnp.bfloat16
    out_bf16 = jax.block_until_ready(fwd(x, prep_bf16))
    assert out_bf16.shape == (B, n_grid)
    assert jnp.all(jnp.isfinite(out_bf16))
    assert jnp.max(jnp.abs(out_bf16 - ref)) < 0.25

    print("KERNEL_OK")
</pallas_src>

<mosaic_0001>
module attributes {stable_mosaic.version = 11 : i64} {
  func.func @_symviewpair_kernel(%arg0: i32, %arg1: memref<8x64xf32, #tpu.memory_space<vmem>>, %arg2: memref<64x128xf32, #tpu.memory_space<vmem>>, %arg3: memref<1x128xf32, #tpu.memory_space<vmem>>, %arg4: memref<128x128xf32, #tpu.memory_space<vmem>>, %arg5: memref<1x128xf32, #tpu.memory_space<vmem>>, %arg6: memref<128x128xf32, #tpu.memory_space<vmem>>, %arg7: memref<1x8xf32, #tpu.memory_space<vmem>>, %arg8: memref<8x8xf32, #tpu.memory_space<vmem>>) attributes {dimension_semantics = [#tpu.dimension_semantics<parallel>], iteration_bounds = array<i64: 1>, scalar_prefetch = 0 : i64, scratch_operands = 0 : i64, tpu.core_type = #tpu.core_type<tc>, window_params = [{transform_indices = @transform_0, window_bounds = array<i64: 8, 64>}, {pipeline_mode = #tpu.pipeline_mode<synchronous>, transform_indices = @transform_1, window_bounds = array<i64: 64, 128>}, {pipeline_mode = #tpu.pipeline_mode<synchronous>, transform_indices = @transform_2, window_bounds = array<i64: 1, 128>}, {pipeline_mode = #tpu.pipeline_mode<synchronous>, transform_indices = @transform_3, window_bounds = array<i64: 128, 128>}, {pipeline_mode = #tpu.pipeline_mode<synchronous>, transform_indices = @transform_4, window_bounds = array<i64: 1, 128>}, {pipeline_mode = #tpu.pipeline_mode<synchronous>, transform_indices = @transform_5, window_bounds = array<i64: 128, 128>}, {pipeline_mode = #tpu.pipeline_mode<synchronous>, transform_indices = @transform_6, window_bounds = array<i64: 1, 8>}, {transform_indices = @transform_7, window_bounds = array<i64: 8, 8>}]} {
    %c0 = arith.constant 0 : index
    %c0_0 = arith.constant 0 : index
    %0 = vector.load %arg1[%c0, %c0_0] : memref<8x64xf32, #tpu.memory_space<vmem>>, vector<8x64xf32>
    %c0_1 = arith.constant 0 : index
    %c0_2 = arith.constant 0 : index
    %1 = vector.load %arg2[%c0_1, %c0_2] : memref<64x128xf32, #tpu.memory_space<vmem>>, vector<64x128xf32>
    %cst = arith.constant dense<0.000000e+00> : vector<8x128xf32>
    %2 = tpu.matmul %0, %1, %cst {dimension_numbers = #tpu.dot_dimension_numbers<[1], [0], [0], [1], [0, 0, 1, 1], [], []>} : vector<8x64xf32>, vector<64x128xf32>, vector<8x128xf32> -> vector<8x128xf32>
    %c0_3 = arith.constant 0 : index
    %c0_4 = arith.constant 0 : index
    %3 = vector.load %arg3[%c0_3, %c0_4] : memref<1x128xf32, #tpu.memory_space<vmem>>, vector<1x128xf32>
    %4 = vector.broadcast %3 : vector<1x128xf32> to vector<8x128xf32>
    %5 = arith.addf %2, %4 : vector<8x128xf32>
    %cst_5 = arith.constant 0.000000e+00 : f32
    %6 = vector.broadcast %cst_5 : f32 to vector<8x128xf32>
    %7 = arith.maximumf %5, %6 : vector<8x128xf32>
    %c0_6 = arith.constant 0 : index
    %c0_7 = arith.constant 0 : index
    %8 = vector.load %arg4[%c0_6, %c0_7] : memref<128x128xf32, #tpu.memory_space<vmem>>, vector<128x128xf32>
    %cst_8 = arith.constant dense<0.000000e+00> : vector<8x128xf32>
    %9 = tpu.matmul %7, %8, %cst_8 {dimension_numbers = #tpu.dot_dimension_numbers<[1], [0], [0], [1], [0, 0, 1, 1], [], []>} : vector<8x128xf32>, vector<128x128xf32>, vector<8x128xf32> -> vector<8x128xf32>
    %c0_9 = arith.constant 0 : index
    %c0_10 = arith.constant 0 : index
    %10 = vector.load %arg5[%c0_9, %c0_10] : memref<1x128xf32, #tpu.memory_space<vmem>>, vector<1x128xf32>
    %11 = vector.broadcast %10 : vector<1x128xf32> to vector<8x128xf32>
    %12 = arith.addf %9, %11 : vector<8x128xf32>
    %cst_11 = arith.constant 0.000000e+00 : f32
    %13 = vector.broadcast %cst_11 : f32 to vector<8x128xf32>
    %14 = arith.maximumf %12, %13 : vector<8x128xf32>
    %c0_12 = arith.constant 0 : index
    %c0_13 = arith.constant 0 : index
    %15 = vector.load %arg6[%c0_12, %c0_13] : memref<128x128xf32, #tpu.memory_space<vmem>>, vector<128x128xf32>
    %cst_14 = arith.constant dense<0.000000e+00> : vector<8x128xf32>
    %16 = tpu.matmul %14, %15, %cst_14 {dimension_numbers = #tpu.dot_dimension_numbers<[1], [0], [0], [1], [0, 0, 1, 1], [], []>} : vector<8x128xf32>, vector<128x128xf32>, vector<8x128xf32> -> vector<8x128xf32>
    %17 = vector.extract_strided_slice %16 {offsets = [0, 0], sizes = [8, 8], strides = [1, 1]} : vector<8x128xf32> to vector<8x8xf32>
    %c0_15 = arith.constant 0 : index
    %c0_16 = arith.constant 0 : index
    %18 = vector.load %arg7[%c0_15, %c0_16] : memref<1x8xf32, #tpu.memory_space<vmem>>, vector<1x8xf32>
    %19 = vector.broadcast %18 : vector<1x8xf32> to vector<8x8xf32>
    %20 = arith.addf %17, %19 : vector<8x8xf32>
    %c0_17 = arith.constant 0 : index
    %c0_18 = arith.constant 0 : index
    %21 = vector.load %arg8[%c0_17, %c0_18] : memref<8x8xf32, #tpu.memory_space<vmem>>, vector<8x8xf32>
    tpu.vector_store %arg8[%c0_17, %c0_18], %20 {strides = array<i32>} : memref<8x8xf32, #tpu.memory_space<vmem>>, vector<8x8xf32>,
    return
  }
  func.func @transform_0(%arg0: i32) -> (i32, i32) {
    %c0_i32 = arith.constant 0 : i32
    %c0_i32_0 = arith.constant 0 : i32
    return %arg0, %c0_i32 : i32, i32
  }
  func.func @transform_1(%arg0: i32) -> (i32, i32) {
    %c0_i32 = arith.constant 0 : i32
    %c0_i32_0 = arith.constant 0 : i32
    %c0_i32_1 = arith.constant 0 : i32
    return %c0_i32, %c0_i32_0 : i32, i32
  }
  func.func @transform_2(%arg0: i32) -> (i32, i32) {
    %c0_i32 = arith.constant 0 : i32
    %c0_i32_0 = arith.constant 0 : i32
    %c0_i32_1 = arith.constant 0 : i32
    return %c0_i32, %c0_i32_0 : i32, i32
  }
  func.func @transform_3(%arg0: i32) -> (i32, i32) {
    %c0_i32 = arith.constant 0 : i32
    %c0_i32_0 = arith.constant 0 : i32
    %c0_i32_1 = arith.constant 0 : i32
    return %c0_i32, %c0_i32_0 : i32, i32
  }
  func.func @transform_4(%arg0: i32) -> (i32, i32) {
    %c0_i32 = arith.constant 0 : i32
    %c0_i32_0 = arith.constant 0 : i32
    %c0_i32_1 = arith.constant 0 : i32
    return %c0_i32, %c0_i32_0 : i32, i32
  }
  func.func @transform_5(%arg0: i32) -> (i32, i32) {
    %c0_i32 = arith.constant 0 : i32
    %c0_i32_0 = arith.constant 0 : i32
    %c0_i32_1 = arith.constant 0 : i32
    return %c0_i32, %c0_i32_0 : i32, i32
  }
  func.func @transform_6(%arg0: i32) -> (i32, i32) {
    %c0_i32 = arith.constant 0 : i32
    %c0_i32_0 = arith.constant 0 : i32
    %c0_i32_1 = arith.constant 0 : i32
    return %c0_i32, %c0_i32_0 : i32, i32
  }
  func.func @transform_7(%arg0: i32) -> (i32, i32) {
    %c0_i32 = arith.constant 0 : i32
    %c0_i32_0 = arith.constant 0 : i32
    return %arg0, %c0_i32 : i32, i32
  }
}

</mosaic_0001>

<bundles_post_ra>
// kernel: sym_view_pair_classifier.1
= control target key start
LH: loop header
LB: loop body
LE: loop exit
PB: predicated region body
PF: predicated region fallthrough
CT: control target
= control target key end

     0   :  { %12 = vsyncpa [#allocation3], 0  ;;  %s759_s0 = inlined_call_operand.hbm [shape: f32[8,64], index: 0, kind: input, shape index: {}]   ;;  %s760_s1 = inlined_call_operand.hbm [shape: f32[64,128], index: 1, kind: input, shape index: {}]   ;;  %s761_s2 = inlined_call_operand.vmem [shape: f32[1,128], index: 2, kind: input, shape index: {}]   ;;  %s762_s3 = inlined_call_operand.hbm [shape: f32[128,128], index: 3, kind: input, shape index: {}]   ;;  %s763_s4 = inlined_call_operand.vmem [shape: f32[1,128], index: 4, kind: input, shape index: {}]   ;;  %s764_s5 = inlined_call_operand.hbm [shape: f32[128,128], index: 5, kind: input, shape index: {}]   ;;  %s765_s6 = inlined_call_operand.vmem [shape: f32[1,8], index: 6, kind: input, shape index: {}]   ;;  %s766_s7 = inlined_call_operand.hbm [shape: f32[8,8], index: 7, kind: output, shape index: {}]  }
   0x1   :  { %13 = vsyncpa [#allocation6], 0 }
   0x2   :  { %14 = vsyncpa [#allocation9], 0 }
   0x3   :  { %15 = vsyncpa [#allocation4], 0  ;;  %s631_s24 = smov [#allocation5]  }
   0x4   :  { %s31_s25 = sshll.u32 %s631_s24, 4  ;;  %s32_s25 = int_to_ptr.vmem [resolvable:$true] %s31_s25 }
   0x5   :  { %s531_s26 = scalar_lea.vmem %s32_s25, 1024  ;;  %p536_p1 = scmp.lt.s32.totalorder %s32_s25, %s32_s25 }
   0x6   :  { %p532_p0 = scmp.ne.s32.totalorder %s32_s25, %s531_s26  ;;  %p537_p2 = scmp.lt.s32.totalorder %s531_s26, %s531_s26 }
   0x8   :  { %p538_p3 = por %p537_p2, %p536_p1 }
   0xa   :  { %p539_p4 = pnand %p538_p3, %p532_p0 }
   0xc   :  { %542 = shalt.err (!%p539_p4)
}
   0xd   :  { %s632_s27 = smov 128   ;;  %s633_s28 = smov 8  }
   0xe   :  { %37 = dma.hbm_to_vmem [thread:$0]  %s760_s1, 1024, %s32_s25, [#allocation6], %s632_s27, %s632_s27, %s633_s28  }
   0xf   :  { %s634_s8 = smov [#allocation2]   ;;  %s635_s10 = smov [#allocation7]  }
  0x10   :  { %s22_s9 = sshll.u32 %s634_s8, 4  ;;  %s45_s11 = sshll.u32 %s635_s10, 4  ;;  %s23_s9 = int_to_ptr.vmem [resolvable:$true] %s22_s9  ;;  %s46_s11 = int_to_ptr.vmem [resolvable:$true] %s45_s11 }
  0x11   :  { %s551_s12 = scalar_lea.vmem %s23_s9, 128  ;;  %p556_p6 = scmp.lt.s32.totalorder %s23_s9, %s23_s9 }
  0x12   :  { %p552_p5 = scmp.ne.s32.totalorder %s23_s9, %s551_s12  ;;  %p557_p7 = scmp.lt.s32.totalorder %s551_s12, %s551_s12 }
  0x14   :  { %p558_p8 = por %p557_p7, %p556_p6 }
  0x16   :  { %p559_p9 = pnand %p558_p8, %p552_p5 }
  0x18   :  { %562 = shalt.err (!%p559_p9)
}
  0x19   :  { %25 = dma.hbm_to_vmem [thread:$0]  %s759_s0, 128, %s23_s9, [#allocation3]  }
  0x1a   :  { %s571_s15 = scalar_lea.vmem %s46_s11, 2048  ;;  %p576_p11 = scmp.lt.s32.totalorder %s46_s11, %s46_s11 }
  0x1b   :  { %p572_p10 = scmp.ne.s32.totalorder %s46_s11, %s571_s15  ;;  %p577_p12 = scmp.lt.s32.totalorder %s571_s15, %s571_s15 }
  0x1d   :  { %p578_p13 = por %p577_p12, %p576_p11 }
  0x1f   :  { %p579_p0 = pnand %p578_p13, %p572_p10 }
  0x21   :  { %582 = shalt.err (!%p579_p0)
}
  0x22   :  { %51 = dma.hbm_to_vmem [thread:$0]  %s762_s3, 2048, %s46_s11, [#allocation6], %s632_s27, %s632_s27, %s633_s28  }
  0x23   :  { %s636_s17 = smov [#allocation8]  }
  0x24   :  { %s59_s18 = sshll.u32 %s636_s17, 4  ;;  %s60_s18 = int_to_ptr.vmem [resolvable:$true] %s59_s18 }
  0x25   :  { %s591_s19 = scalar_lea.vmem %s60_s18, 2048  ;;  %p596_p2 = scmp.lt.s32.totalorder %s60_s18, %s60_s18 }
  0x26   :  { %p592_p1 = scmp.ne.s32.totalorder %s60_s18, %s591_s19  ;;  %p597_p3 = scmp.lt.s32.totalorder %s591_s19, %s591_s19 }
  0x28   :  { %p598_p4 = por %p597_p3, %p596_p2 }
  0x2a   :  { %p599_p5 = pnand %p598_p4, %p592_p1 }
  0x2c   :  { %602 = shalt.err (!%p599_p5)
}
  0x2d   :  { %65 = dma.hbm_to_vmem [thread:$0]  %s764_s5, 2048, %s60_s18, [#allocation9], %s632_s27, %s632_s27, %s633_s28  }
  0x2e   :  { %623 = dma.done.wait [#allocation3], 128  }
  0x2f   :  { %624 = vsyncadd [#allocation3], 4294967168 }
  0x30   :  { %625 = dma.done.wait [#allocation6], 3072  }
  0x31   :  { %626 = vsyncadd [#allocation6], 4294964224 }
  0x32   :  { %627 = dma.done.wait [#allocation9], 2048  }
  0x33   :  { %628 = vsyncadd [#allocation9], 4294965248  ;;  %v637_v0 = vmov 0.0   ;;  %vm638_vm0 = vmmov 0   ;;  %v88_v1 = vld [vmem:[#allocation5 + $0x38] sm:$0xff]  ;;  %v87_v2 = vld [vmem:[#allocation5 + $0x30] sm:$0xff] }
  0x34   :  { %425 = vmatprep.subr.mxu0 %v637_v0  ;;  %441 = vmatprep.mubr.msk.f32.mxu0 %vm638_vm0, %v637_v0  ;;  %v86_v3 = vld [vmem:[#allocation5 + $0x28] sm:$0xff]  ;;  %v186_v4 = vld [vmem:[#allocation7 + $0x78] sm:$0xff]  ;;  %v185_v5 = vld [vmem:[#allocation7 + $0x70] sm:$0xff]  ;;  %vm96_vm1 = vcmask 523264   ;;  %s639_s24 = smov [#allocation10]   ;;  %vm359_vm2 = vcmask 64512  }
  0x35   :  { %444 = vmatprep.subr.mxu1 %v637_v0  ;;  %476 = vmatprep.mubr.msk.f32.mxu1 %vm638_vm0, %v637_v0  ;;  %v85_v6 = vld [vmem:[#allocation5 + $0x20] sm:$0xff]  ;;  %v184_v7 = vld [vmem:[#allocation7 + $0x68] sm:$0xff]  ;;  %v84_v8 = vld [vmem:[#allocation5 + $0x18] sm:$0xff]  ;;  %s367_s25 = sshll.u32 %s639_s24, 4  ;;  %s368_s25 = int_to_ptr.vmem [resolvable:$true] %s367_s25 }
  0x36   :  { %426 = vmatpush3.msra.mxu0 %v88_v1  ;;  %445 = vmatpush3.msra.mxu1 %v186_v4  ;;  %v183_v9 = vld [vmem:[#allocation7 + $0x60] sm:$0xff]  ;;  %v83_v10 = vld [vmem:[#allocation5 + $0x10] sm:$0xff]  ;;  %v182_v11 = vld [vmem:[#allocation7 + $0x58] sm:$0xff]  ;;  %s603_s26 = scalar_lea.vmem %s368_s25, 128  ;;  %p608_p7 = scmp.lt.s32.totalorder %s368_s25, %s368_s25 }
  0x37   :  { %427 = vmatprep.subr.mxu0 %v637_v0  ;;  %446 = vmatprep.subr.mxu1 %v637_v0  ;;  %v82_v12 = vld [vmem:[#allocation5 + $0x8] sm:$0xff]  ;;  %v181_v13 = vld [vmem:[#allocation7 + $0x50] sm:$0xff]  ;;  %v81_v14 = vld [vmem:[#allocation5] sm:$0xff]  ;;  %p604_p6 = scmp.ne.s32.totalorder %s368_s25, %s603_s26  ;;  %p609_p8 = scmp.lt.s32.totalorder %s603_s26, %s603_s26 }
  0x38   :  { %428 = vmatpush3.msra.mxu0 %v87_v2  ;;  %447 = vmatpush3.msra.mxu1 %v185_v5  ;;  %v80_v15 = vld [vmem:[#allocation2] sm:$0xff]  ;;  %v180_v16 = vld [vmem:[#allocation7 + $0x48] sm:$0xff]  ;;  %v179_v17 = vld [vmem:[#allocation7 + $0x40] sm:$0xff] }
  0x39   :  { %429 = vmatprep.subr.mxu0 %v637_v0  ;;  %448 = vmatprep.subr.mxu1 %v637_v0  ;;  %v178_v18 = vld [vmem:[#allocation7 + $0x38] sm:$0xff]  ;;  %v177_v19 = vld [vmem:[#allocation7 + $0x30] sm:$0xff]  ;;  %v176_v20 = vld [vmem:[#allocation7 + $0x28] sm:$0xff]  ;;  %p610_p9 = por %p609_p8, %p608_p7 }
  0x3a   :  { %430 = vmatpush3.msra.mxu0 %v86_v3  ;;  %449 = vmatpush3.msra.mxu1 %v184_v7  ;;  %v175_v21 = vld [vmem:[#allocation7 + $0x20] sm:$0xff]  ;;  %v174_v22 = vld [vmem:[#allocation7 + $0x18] sm:$0xff]  ;;  %v173_v23 = vld [vmem:[#allocation7 + $0x10] sm:$0xff] }
  0x3b   :  { %431 = vmatprep.subr.mxu0 %v637_v0  ;;  %450 = vmatprep.subr.mxu1 %v637_v0  ;;  %v172_v24 = vld [vmem:[#allocation7 + $0x8] sm:$0xff]  ;;  %v171_v25 = vld [vmem:[#allocation7] sm:$0xff]  ;;  %v280_v26 = vld [vmem:[#allocation8 + $0x78] sm:$0xff]  ;;  %p611_p10 = pnand %p610_p9, %p604_p6 }
  0x3c   :  { %432 = vmatpush3.msra.mxu0 %v85_v6  ;;  %451 = vmatpush3.msra.mxu1 %v183_v9  ;;  %v279_v27 = vld [vmem:[#allocation8 + $0x70] sm:$0xff]  ;;  %v278_v28 = vld [vmem:[#allocation8 + $0x68] sm:$0xff]  ;;  %v277_v29 = vld [vmem:[#allocation8 + $0x60] sm:$0xff] }
  0x3d   :  { %433 = vmatprep.subr.mxu0 %v637_v0  ;;  %452 = vmatprep.subr.mxu1 %v637_v0  ;;  %v276_v30 = vld [vmem:[#allocation8 + $0x58] sm:$0xff]  ;;  %v275_v31 = vld [vmem:[#allocation8 + $0x50] sm:$0xff]  ;;  %v274_v32 = vld [vmem:[#allocation8 + $0x48] sm:$0xff] }
  0x3e   :  { %434 = vmatpush3.msra.mxu0 %v84_v8  ;;  %453 = vmatpush3.msra.mxu1 %v182_v11  ;;  %v273_v33 = vld [vmem:[#allocation8 + $0x40] sm:$0xff]  ;;  %v272_v34 = vld [vmem:[#allocation8 + $0x38] sm:$0xff]  ;;  %v271_v35 = vld [vmem:[#allocation8 + $0x30] sm:$0xff] }
  0x3f   :  { %435 = vmatprep.subr.mxu0 %v637_v0  ;;  %454 = vmatprep.subr.mxu1 %v637_v0  ;;  %v270_v36 = vld [vmem:[#allocation8 + $0x28] sm:$0xff]  ;;  %v269_v37 = vld [vmem:[#allocation8 + $0x20] sm:$0xff]  ;;  %v268_v38 = vld [vmem:[#allocation8 + $0x18] sm:$0xff] }
  0x40   :  { %436 = vmatpush3.msra.mxu0 %v83_v10  ;;  %455 = vmatpush3.msra.mxu1 %v181_v13  ;;  %v378_v39 = vld [vmem:[%s761_s2] ss:$0 sm:$0xff]  ;;  %v267_v44 = vld [vmem:[#allocation8 + $0x10] sm:$0xff]  ;;  %v266_v45 = vld [vmem:[#allocation8 + $0x8] sm:$0xff] }
  0x41   :  { %437 = vmatprep.subr.mxu0 %v637_v0  ;;  %456 = vmatprep.subr.mxu1 %v637_v0  ;;  %v265_v46 = vld [vmem:[#allocation8] sm:$0xff]  ;;  %v380_v47 = vld [vmem:[%s763_s4] ss:$0 sm:$0xff] }
  0x42   :  { %438 = vmatpush3.msra.mxu0 %v82_v12  ;;  %457 = vmatpush3.msra.mxu1 %v180_v16  ;;  %v381_v52 = vld [vmem:[%s765_s6] ss:$0 sm:$0xff] }
  0x43   :  { %439 = vmatprep.subr.mxu0 %v637_v0  ;;  %458 = vmatprep.subr.mxu1 %v637_v0 }
  0x44   :  { %440 = vmatpush3.msra.mxu0 %v81_v14  ;;  %459 = vmatpush3.msra.mxu1 %v179_v17 }
  0x45   :  { %442 = vmatmul.mubr.msk.f32.vlgmr.msra.gmra.mxu0 %vm96_vm1, %v80_v15  ;;  %479 = vmatprep.subr.mxu0 %v637_v0 }
  0x46   :  { %511 = vmatprep.mubr.msk.f32.mxu0 %vm638_vm0, %v637_v0  ;;  %460 = vmatprep.subr.mxu1 %v637_v0 }
  0x47   :  { %461 = vmatpush3.msra.mxu1 %v178_v18  ;;  %480 = vmatpush3.msra.mxu0 %v280_v26 }
  0x48   :  { %462 = vmatprep.subr.mxu1 %v637_v0  ;;  %481 = vmatprep.subr.mxu0 %v637_v0 }
  0x49   :  { %463 = vmatpush3.msra.mxu1 %v177_v19  ;;  %482 = vmatpush3.msra.mxu0 %v279_v27 }
  0x4a   :  { %464 = vmatprep.subr.mxu1 %v637_v0  ;;  %483 = vmatprep.subr.mxu0 %v637_v0 }
  0x4b   :  { %465 = vmatpush3.msra.mxu1 %v176_v20  ;;  %484 = vmatpush3.msra.mxu0 %v278_v28 }
  0x4c   :  { %466 = vmatprep.subr.mxu1 %v637_v0  ;;  %485 = vmatprep.subr.mxu0 %v637_v0 }
  0x4d   :  { %467 = vmatpush3.msra.mxu1 %v175_v21  ;;  %486 = vmatpush3.msra.mxu0 %v277_v29 }
  0x4e   :  { %468 = vmatprep.subr.mxu1 %v637_v0  ;;  %487 = vmatprep.subr.mxu0 %v637_v0 }
  0x4f   :  { %469 = vmatpush3.msra.mxu1 %v174_v22  ;;  %488 = vmatpush3.msra.mxu0 %v276_v30 }
  0x50   :  { %470 = vmatprep.subr.mxu1 %v637_v0  ;;  %489 = vmatprep.subr.mxu0 %v637_v0 }
  0x51   :  { %471 = vmatpush3.msra.mxu1 %v173_v23  ;;  %490 = vmatpush3.msra.mxu0 %v275_v31 }
  0x52   :  { %472 = vmatprep.subr.mxu1 %v637_v0  ;;  %491 = vmatprep.subr.mxu0 %v637_v0 }
  0x53   :  { %473 = vmatpush3.msra.mxu1 %v172_v24  ;;  %492 = vmatpush3.msra.mxu0 %v274_v32 }
  0x54   :  { %474 = vmatprep.subr.mxu1 %v637_v0  ;;  %493 = vmatprep.subr.mxu0 %v637_v0 }
  0x55   :  { %475 = vmatpush3.msra.mxu1 %v171_v25  ;;  %494 = vmatpush3.msra.mxu0 %v273_v33 }
  0x56   :  { %495 = vmatprep.subr.mxu0 %v637_v0 }
  0x57   :  { %496 = vmatpush3.msra.mxu0 %v272_v34 }
  0x58   :  { %497 = vmatprep.subr.mxu0 %v637_v0 }
  0x59   :  { %498 = vmatpush3.msra.mxu0 %v271_v35 }
  0x5a   :  { %499 = vmatprep.subr.mxu0 %v637_v0 }
  0x5b   :  { %500 = vmatpush3.msra.mxu0 %v270_v36 }
  0x5c   :  { %501 = vmatprep.subr.mxu0 %v637_v0 }
  0x5d   :  { %502 = vmatpush3.msra.mxu0 %v269_v37 }
  0x5e   :  { %503 = vmatprep.subr.mxu0 %v637_v0 }
  0x5f   :  { %504 = vmatpush3.msra.mxu0 %v268_v38 }
  0x60   :  { %505 = vmatprep.subr.mxu0 %v637_v0 }
  0x61   :  { %506 = vmatpush3.msra.mxu0 %v267_v44 }
  0x62   :  { %507 = vmatprep.subr.mxu0 %v637_v0 }
  0x63   :  { %508 = vmatpush3.msra.mxu0 %v266_v45 }
  0x64   :  { %509 = vmatprep.subr.mxu0 %v637_v0 }
  0x65   :  { %510 = vmatpush3.msra.mxu0 %v265_v46 }
 0x105   :  { %v166_v40 = vpop.f32.mrf.mxu0 }
 0x106   :  { %v167_v41 = vadd.f32 %v378_v39, %v166_v40 }
 0x107   :  { %v443_v42 = vpop.f32.mrf.mxu0 }
 0x108   :  { %v170_v43 = vmax.f32 %v167_v41, 0.0 }
 0x10a   :  { %477 = vmatmul.mubr.f32.vlgmr.msra.gmra.mxu1 %v170_v43 }
 0x1ca   :  { %v260_v48 = vpop.f32.mrf.mxu1 }
 0x1cb   :  { %v261_v49 = vadd.f32 %v380_v47, %v260_v48 }
 0x1cc   :  { %v478_v50 = vpop.f32.mrf.mxu1 }
 0x1cd   :  { %v264_v51 = vmax.f32 %v261_v49, 0.0 }
 0x1cf   :  { %512 = vmatmul.mubr.f32.vlgmr.msra.gmra.mxu0 %v264_v51 }
 0x28f   :  { %v347_v53 = vpop.f32.mrf.mxu0 }
 0x290   :  { %v358_v54 = vadd.f32 %v381_v52, %v347_v53 }
 0x291   :  { %v513_v55 = vpop.f32.mrf.mxu0 }
 0x292   :  { %360 = vst.msk [vmem:[#allocation10] sm:$0xff] %vm359_vm2, %v358_v54 }
 0x293   :  { %614 = shalt.err (!%p611_p10)
}
 0x294   :  { %370 = dma.vmem_to_hbm [thread:$0]  %s368_s25, 128, %s766_s7, [#allocation4]  }
 0x295   :  { %629 = dma.done.wait [#allocation4], 128  }
 0x296   :  { %630 = vsyncadd [#allocation4], 4294967168 }
 0x297   :  { %374 = vsyncpa [#allocation3], 1 }
 0x298   :  { %375 = vsyncpa [#allocation6], 1 }
 0x299   :  { %376 = vsyncpa [#allocation9], 1 }
 0x29a   :  { %377 = vsyncpa [#allocation4], 1 }

</bundles_post_ra>
